<compile_context>
chip_gen: v7x
topology: tpu7x:2x2x1
jax: 0.10.0
libtpu: 0.0.40
codegen_flags: <defaults>
</compile_context>

<pallas_src>
import functools

import jax
import jax.numpy as jnp
from jax.experimental import pallas as pl
from jax.experimental.pallas import tpu as pltpu


# --------------------------------------------------------------------------- helpers

def _round_up(x, m):
    return ((x + m - 1) // m) * m


def _pad2d(a, rows, cols):
    r, c = a.shape
    if (r, c) == (rows, cols):
        return a
    return jnp.pad(a, ((0, rows - r), (0, cols - c)))


def _choose_tile(dim, align, pref):
    """Pick (tile, padded_dim): aligned, close to `pref`, minimal over-padding."""
    base = _round_up(dim, align)
    if base <= pref:
        return base, base                       # single tile, zero re-fetch / no pad
    best = align
    d = align
    while d <= pref:
        if base % d == 0:
            best = d
        d += align
    if best * 2 >= pref:                        # decent divisor -> no padding beyond base
        return best, base
    return pref, _round_up(base, pref)          # classic round-up (<= one tile of pad)


# --------------------------------------------------------------------------- kernel

def _revlinear_mm_kernel(x_ref, a_ref, *rest, add_bias, use_acc):
    """acc += bf16(x) @ A_bf16 (f32 MXU accumulate); epilogue adds bias / casts.

    add_bias: whether a (1, tn) f32 bias operand is present.
    use_acc:  True -> f32 VMEM scratch accumulator + cast epilogue (non-f32 outputs);
              False -> accumulate straight into the f32 output tile (no scratch/copy).
    """
    refs = rest if add_bias else (None,) + tuple(rest)
    if use_acc:
        b_ref, o_ref, acc_ref = refs
        acc = acc_ref
    else:
        b_ref, o_ref = refs
        acc = o_ref

    @pl.when(pl.program_id(2) == 0)
    def _init():
        acc[...] = jnp.zeros_like(acc)

    # A is already bf16 (pre-cast at init); only x is packed to bf16 here.
    acc[...] += jnp.dot(x_ref[...].astype(jnp.bfloat16), a_ref[...],
                        preferred_element_type=jnp.float32)

    if use_acc or add_bias:
        @pl.when(pl.program_id(2) == pl.num_programs(2) - 1)
        def _finalize():
            if use_acc:
                res = acc[...]
                if add_bias:
                    res = res + b_ref[...]
                o_ref[...] = res.astype(o_ref.dtype)
            else:
                o_ref[...] += b_ref[...]


# --------------------------------------------------------------------------- wrapper

def revlinear_forward(x, a_packed, n_out, post_bias=None, *,
                      tm_pref=512, tn_pref=512, tk_pref=512,
                      force_pallas=False):
    """Fused x @ A [+ bias] on the MXU, tiled over (M, N, K).

    `a_packed` is the weight pre-cast to bf16 and pre-padded to
    (round_up(K,128), round_up(N,128)); `n_out` is the logical output width.
    """
    M, K = x.shape
    Kp0, Np0 = a_packed.shape
    assert a_packed.dtype == jnp.bfloat16
    assert K <= Kp0 and n_out <= Np0
    out_dtype = x.dtype

    # Small-problem fast path: per-grid-step overhead + lane padding dominate there.
    if not force_pallas and (M * K <= 256 * 1024 and K * n_out <= 256 * 1024):
        y = jnp.dot(x.astype(jnp.bfloat16), a_packed[:K, :n_out],
                    preferred_element_type=jnp.float32)
        if post_bias is not None:
            y = y + post_bias.astype(jnp.float32)
        return y.astype(out_dtype)

    # Tile selection: sublane-aligned M, lane-dense (128-multiple) N/K, minimal over-pad.
    tm, Mp = _choose_tile(M, 8, tm_pref)
    tn, Np = _choose_tile(n_out, 128, tn_pref)
    tk, Kp = _choose_tile(K, 128, tk_pref)

    # v7x has 2 TensorCores: don't let every "parallel" axis collapse to one program.
    if Mp // tm == 1 and Np // tn == 1 and Np % 256 == 0:
        tn = Np // 2

    x_p = _pad2d(x, Mp, Kp)                 # zero-pad K: required for the reduction
    a_p = _pad2d(a_packed, Kp, Np)          # no-op unless tile round-up grew N/K

    grid = (Mp // tm, Np // tn, Kp // tk)

    x_spec = pl.BlockSpec((tm, tk), lambda i, j, k: (i, k))
    a_spec = pl.BlockSpec((tk, tn), lambda i, j, k: (k, j))
    out_spec = pl.BlockSpec((tm, tn), lambda i, j, k: (i, j))

    add_bias = post_bias is not None
    use_acc = out_dtype != jnp.float32      # f32 out: accumulate straight into o_ref

    in_specs = [x_spec, a_spec]
    operands = [x_p, a_p]
    if add_bias:
        in_specs.append(pl.BlockSpec((1, tn), lambda i, j, k: (0, j)))
        operands.append(
            _pad2d(post_bias.reshape(1, n_out).astype(jnp.float32), 1, Np))

    scratch_shapes = [pltpu.VMEM((tm, tn), jnp.float32)] if use_acc else []

    # Double-buffered VMEM footprint + headroom; explicit limit so large tiles still
    # pipeline on v5e's 16 MiB scoped default, capped well under v7x's 64 MiB physical.
    vmem_bytes = 2 * (tm * tk * x_p.dtype.itemsize          # f32 x tiles
                      + tk * tn * 2                          # bf16 A tiles
                      + tm * tn * jnp.dtype(out_dtype).itemsize
                      + (tn * 4 if add_bias else 0))
    if use_acc:
        vmem_bytes += tm * tn * 4
    vmem_limit = int(min(max(vmem_bytes + (4 << 20), 16 << 20), 56 << 20))

    cost = pl.CostEstimate(
        flops=2 * Mp * Np * Kp,
        transcendentals=0,
        bytes_accessed=(Mp * Kp * x_p.dtype.itemsize
                        + Kp * Np * 2
                        + Mp * Np * jnp.dtype(out_dtype).itemsize))

    kernel = functools.partial(_revlinear_mm_kernel,
                               add_bias=add_bias, use_acc=use_acc)

    out_p = pl.pallas_call(
        kernel,
        out_shape=jax.ShapeDtypeStruct((Mp, Np), out_dtype),
        grid_spec=pltpu.PrefetchScalarGridSpec(
            num_scalar_prefetch=0,
            grid=grid,
            in_specs=in_specs,
            out_specs=out_spec,
            scratch_shapes=scratch_shapes),
        compiler_params=pltpu.CompilerParams(
            dimension_semantics=("parallel", "parallel", "arbitrary"),
            vmem_limit_bytes=vmem_limit),
        cost_estimate=cost,
    )(*operands)

    if (Mp, Np) != (M, n_out):
        out_p = out_p[:M, :n_out]
    return out_p


# --------------------------------------------------------------------------- module

class RevLinearPallas:
    """JAX/Pallas port of RevLinear. Parameters initialized deterministically."""

    def __init__(self, in_features, out_features, key, bias=True,
                 inverse_param=False, inv_pinv=True):
        self.in_features = in_features
        self.out_features = out_features
        # torch.rand(out_features, in_features).T -> uniform [0,1), shape (in, out)
        self.A = jax.random.uniform(
            key, (out_features, in_features), dtype=jnp.float32).T
        self.A_inv = (jnp.zeros((in_features, out_features), jnp.float32)
                      if inverse_param else None)
        if bias:
            self.bias = jnp.zeros((out_features,), jnp.float32)
            self.bias_inv = jnp.zeros((in_features,), jnp.float32)
        else:
            self.bias = None
            self.bias_inv = None
        self.inv_pinv = inv_pinv

        # Weight pre-cast to bf16 + pre-padded to lane-aligned ONCE (not per call).
        self._A_packed = self._pack(self.A)
        self._inv_cache = None      # (packed bf16 inverse matrix, logical N, eff bias)

    @staticmethod
    def _pack(mat):
        k, n = mat.shape
        return _pad2d(mat.astype(jnp.bfloat16), _round_up(k, 128), _round_up(n, 128))

    def _inverse(self):
        """Cached (packed inverse matrix, logical out width, folded effective bias)."""
        # TODO(synk): pinv (SVD-class op) has no clean Pallas equivalent; computed once
        # in plain JAX (eagerly, outside jit) and cached.
        if self._inv_cache is None:
            if self.A_inv is None:
                m = self.A                               # original module semantics
            elif self.inv_pinv:
                m = jnp.linalg.pinv(self.A + self.A_inv)
            else:
                m = jnp.linalg.pinv(self.A) + self.A_inv.T
            n_out = m.shape[1]
            # Fold pre-bias: (x - b) @ M + b_inv == x @ M + (b_inv - b @ M)
            eff = self.bias_inv
            if self.bias is not None:
                fold = -jnp.dot(self.bias, m)            # tiny GEMV, plain JAX, once
                eff = fold if eff is None else eff + fold
            self._inv_cache = (self._pack(m), n_out, eff)
        return self._inv_cache

    def __call__(self, x, inverse=False, *, force_pallas=False):
        if not inverse:
            return revlinear_forward(x, self._A_packed, self.out_features,
                                     post_bias=self.bias, force_pallas=force_pallas)
        m_packed, n_out, eff_bias = self._inverse()
        return revlinear_forward(x, m_packed, n_out,
                                 post_bias=eff_bias, force_pallas=force_pallas)


# --------------------------------------------------------------------------- demo

if __name__ == "__main__":
    key = jax.random.PRNGKey(0)
    (k_param, k_x, k_param2, k_x2, k_b1, k_b2,
     k_a3, k_x3, k_b3) = jax.random.split(key, 9)

    # ---- forward path (small): XLA fast path AND forced Pallas kernel -------
    batch, in_features, out_features = 8, 32, 64
    layer = RevLinearPallas(in_features, out_features, k_param, bias=True)
    x = jax.random.normal(k_x, (batch, in_features), dtype=jnp.float32)

    y_fast = jax.block_until_ready(layer(x))                     # small-shape fast path
    y_pal = jax.block_until_ready(layer(x, force_pallas=True))   # Pallas kernel
    assert y_pal.shape == (batch, out_features) and y_pal.dtype == jnp.float32

    y_bf_ref = (jnp.dot(x.astype(jnp.bfloat16), layer.A.astype(jnp.bfloat16),
                        preferred_element_type=jnp.float32) + layer.bias)
    assert jnp.allclose(y_pal, y_bf_ref, atol=2e-3, rtol=1e-3), "fwd mismatch (bf16 ref)"
    assert jnp.allclose(y_fast, y_bf_ref, atol=2e-3, rtol=1e-3), "fast-path mismatch"
    y_f32_ref = x @ layer.A + layer.bias
    assert jnp.allclose(y_pal, y_f32_ref, atol=1e-1, rtol=5e-2), "fwd mismatch (f32 ref)"

    # ---- inverse path (square, A_inv=None): (x - b) @ A + b_inv, bias folded --
    d = 64
    layer2 = RevLinearPallas(d, d, k_param2, bias=True)
    layer2.bias = 0.1 * jax.random.normal(k_b1, (d,), dtype=jnp.float32)
    layer2.bias_inv = 0.05 * jax.random.normal(k_b2, (d,), dtype=jnp.float32)
    x2 = jax.random.normal(k_x2, (batch, d), dtype=jnp.float32)

    y2 = jax.block_until_ready(layer2(x2, inverse=True, force_pallas=True))
    eff = layer2.bias_inv - jnp.dot(layer2.bias, layer2.A)
    y2_bf_ref = (jnp.dot(x2.astype(jnp.bfloat16), layer2.A.astype(jnp.bfloat16),
                         preferred_element_type=jnp.float32) + eff)
    assert jnp.allclose(y2, y2_bf_ref, atol=2e-3, rtol=1e-3), "inverse mismatch (bf16)"
    y2_f32_ref = (x2 - layer2.bias) @ layer2.A + layer2.bias_inv
    assert jnp.allclose(y2, y2_f32_ref, atol=2.5e-1, rtol=5e-2), "inverse mismatch (f32)"

    # ---- multi-step grid: exercises k-reduction accumulate + bias epilogue ---
    M3, K3, N3 = 256, 384, 256
    A3 = jax.random.uniform(k_a3, (K3, N3), dtype=jnp.float32)
    b3 = 0.1 * jax.random.normal(k_b3, (N3,), dtype=jnp.float32)
    x3 = jax.random.normal(k_x3, (M3, K3), dtype=jnp.float32)
    y3 = jax.block_until_ready(
        revlinear_forward(x3, A3.astype(jnp.bfloat16), N3, post_bias=b3,
                          tm_pref=128, tn_pref=128, tk_pref=128, force_pallas=True))
    y3_ref = (jnp.dot(x3.astype(jnp.bfloat16), A3.astype(jnp.bfloat16),
                      preferred_element_type=jnp.float32) + b3)
    assert jnp.allclose(y3, y3_ref, atol=1e-2, rtol=1e-3), "multi-grid mismatch"

    print("KERNEL_OK")
</pallas_src>

<mosaic_0001>
module attributes {stable_mosaic.version = 11 : i64} {
  func.func @_revlinear_mm_kernel(%arg0: i32, %arg1: i32, %arg2: i32, %arg3: memref<8x128xf32, #tpu.memory_space<vmem>>, %arg4: memref<128x128xbf16, #tpu.memory_space<vmem>>, %arg5: memref<1x128xf32, #tpu.memory_space<vmem>>, %arg6: memref<8x128xf32, #tpu.memory_space<vmem>>) attributes {dimension_semantics = [#tpu.dimension_semantics<parallel>, #tpu.dimension_semantics<parallel>, #tpu.dimension_semantics<arbitrary>], iteration_bounds = array<i64: 1, 1, 1>, scalar_prefetch = 0 : i64, scratch_operands = 0 : i64, tpu.core_type = #tpu.core_type<tc>, window_params = [{transform_indices = @transform_0, window_bounds = array<i64: 8, 128>}, {transform_indices = @transform_1, window_bounds = array<i64: 128, 128>}, {transform_indices = @transform_2, window_bounds = array<i64: 1, 128>}, {transform_indices = @transform_3, window_bounds = array<i64: 8, 128>}]} {
    %c0_i32 = arith.constant 0 : i32
    %0 = arith.cmpi eq, %arg2, %c0_i32 : i32
    %1 = arith.extui %0 : i1 to i32
    %c0_i32_0 = arith.constant 0 : i32
    %2 = arith.cmpi ne, %1, %c0_i32_0 : i32
    scf.if %2 {
      %cst_10 = arith.constant 0.000000e+00 : f32
      %13 = vector.broadcast %cst_10 : f32 to vector<8x128xf32>
      %c0_11 = arith.constant 0 : index
      %c0_12 = arith.constant 0 : index
      %14 = vector.load %arg6[%c0_11, %c0_12] : memref<8x128xf32, #tpu.memory_space<vmem>>, vector<8x128xf32>
      tpu.vector_store %arg6[%c0_11, %c0_12], %13 {strides = array<i32>} : memref<8x128xf32, #tpu.memory_space<vmem>>, vector<8x128xf32>,
    } else {
    }
    %c0 = arith.constant 0 : index
    %c0_1 = arith.constant 0 : index
    %3 = vector.load %arg6[%c0, %c0_1] : memref<8x128xf32, #tpu.memory_space<vmem>>, vector<8x128xf32>
    %c0_2 = arith.constant 0 : index
    %c0_3 = arith.constant 0 : index
    %4 = vector.load %arg3[%c0_2, %c0_3] : memref<8x128xf32, #tpu.memory_space<vmem>>, vector<8x128xf32>
    %5 = arith.truncf %4 : vector<8x128xf32> to vector<8x128xbf16>
    %c0_4 = arith.constant 0 : index
    %c0_5 = arith.constant 0 : index
    %6 = vector.load %arg4[%c0_4, %c0_5] : memref<128x128xbf16, #tpu.memory_space<vmem>>, vector<128x128xbf16>
    %cst = arith.constant dense<0.000000e+00> : vector<8x128xf32>
    %7 = tpu.matmul %5, %6, %cst {dimension_numbers = #tpu.dot_dimension_numbers<[1], [0], [0], [1], [0, 0, 1, 1], [], []>} : vector<8x128xbf16>, vector<128x128xbf16>, vector<8x128xf32> -> vector<8x128xf32>
    %8 = arith.addf %3, %7 : vector<8x128xf32>
    %c0_6 = arith.constant 0 : index
    %c0_7 = arith.constant 0 : index
    %9 = vector.load %arg6[%c0_6, %c0_7] : memref<8x128xf32, #tpu.memory_space<vmem>>, vector<8x128xf32>
    tpu.vector_store %arg6[%c0_6, %c0_7], %8 {strides = array<i32>} : memref<8x128xf32, #tpu.memory_space<vmem>>, vector<8x128xf32>,
    %c0_i32_8 = arith.constant 0 : i32
    %10 = arith.cmpi eq, %arg2, %c0_i32_8 : i32
    %11 = arith.extui %10 : i1 to i32
    %c0_i32_9 = arith.constant 0 : i32
    %12 = arith.cmpi ne, %11, %c0_i32_9 : i32
    scf.if %12 {
      %c0_10 = arith.constant 0 : index
      %c0_11 = arith.constant 0 : index
      %13 = vector.load %arg6[%c0_10, %c0_11] : memref<8x128xf32, #tpu.memory_space<vmem>>, vector<8x128xf32>
      %c0_12 = arith.constant 0 : index
      %c0_13 = arith.constant 0 : index
      %14 = vector.load %arg5[%c0_12, %c0_13] : memref<1x128xf32, #tpu.memory_space<vmem>>, vector<1x128xf32>
      %15 = vector.broadcast %14 : vector<1x128xf32> to vector<8x128xf32>
      %16 = arith.addf %13, %15 : vector<8x128xf32>
      %c0_14 = arith.constant 0 : index
      %c0_15 = arith.constant 0 : index
      %17 = vector.load %arg6[%c0_14, %c0_15] : memref<8x128xf32, #tpu.memory_space<vmem>>, vector<8x128xf32>
      tpu.vector_store %arg6[%c0_14, %c0_15], %16 {strides = array<i32>} : memref<8x128xf32, #tpu.memory_space<vmem>>, vector<8x128xf32>,
    } else {
    }
    return
  }
  func.func @transform_0(%arg0: i32, %arg1: i32, %arg2: i32) -> (i32, i32) {
    %c0_i32 = arith.constant 0 : i32
    return %arg0, %arg2 : i32, i32
  }
  func.func @transform_1(%arg0: i32, %arg1: i32, %arg2: i32) -> (i32, i32) {
    %c0_i32 = arith.constant 0 : i32
    return %arg2, %arg1 : i32, i32
  }
  func.func @transform_2(%arg0: i32, %arg1: i32, %arg2: i32) -> (i32, i32) {
    %c0_i32 = arith.constant 0 : i32
    %c0_i32_0 = arith.constant 0 : i32
    return %c0_i32, %arg1 : i32, i32
  }
  func.func @transform_3(%arg0: i32, %arg1: i32, %arg2: i32) -> (i32, i32) {
    %c0_i32 = arith.constant 0 : i32
    return %arg0, %arg1 : i32, i32
  }
}

</mosaic_0001>

<bundles_post_ra>
// kernel: tpu_custom_call.1
= control target key start
LH: loop header
LB: loop body
LE: loop exit
PB: predicated region body
PF: predicated region fallthrough
CT: control target
= control target key end

     0   :  { %8 = vsyncpa [#allocation3], 0  ;;  %s383_s0 = inlined_call_operand.hbm [shape: f32[8,128], index: 0, kind: input, shape index: {}]   ;;  %s384_s1 = inlined_call_operand.hbm [shape: bf16[128,128], index: 1, kind: input, shape index: {}]   ;;  %s385_s2 = inlined_call_operand.vmem [shape: f32[1,128], index: 2, kind: input, shape index: {}]   ;;  %s386_s3 = inlined_call_operand.hbm [shape: f32[8,128], index: 3, kind: output, shape index: {}]  }
   0x1   :  { %9 = vsyncpa [#allocation6], 0 }
   0x2   :  { %10 = vsyncpa [#allocation4], 0  ;;  %s310_s12 = smov [#allocation2]   ;;  %s311_s14 = smov [#allocation5]  }
   0x3   :  { %s17_s13 = sshll.u32 %s310_s12, 4  ;;  %s26_s15 = sshll.u32 %s311_s14, 4  ;;  %s18_s13 = int_to_ptr.vmem [resolvable:$true] %s17_s13  ;;  %s337_s15 = int_to_ptr.vmem [resolvable:$true] %s26_s15 }
   0x4   :  { %s238_s18 = scalar_lea.hbm %s383_s0, 128 }
   0x5   :  { %p239_p0 = scmp.ne.s32.totalorder %s383_s0, %s238_s18  ;;  %p242_p1 = scmp.lt.u32.totalorder %s238_s18, %s383_s0 }
   0x7   :  { %p244_p2 = pnand %p242_p1, %p239_p0 }
   0x9   :  { %247 = shalt.err (!%p244_p2)
}
   0xa   :  { %s248_s23 = scalar_lea.vmem %s18_s13, 128  ;;  %p253_p4 = scmp.lt.s32.totalorder %s18_s13, %s18_s13 }
   0xb   :  { %p249_p3 = scmp.ne.s32.totalorder %s18_s13, %s248_s23  ;;  %p254_p5 = scmp.lt.s32.totalorder %s248_s23, %s248_s23 }
   0xd   :  { %p255_p6 = por %p254_p5, %p253_p4 }
   0xf   :  { %p256_p7 = pnand %p255_p6, %p249_p3 }
  0x11   :  { %259 = shalt.err (!%p256_p7)
}
  0x12   :  { %20 = dma.hbm_to_vmem [thread:$0]  %s383_s0, 128, %s18_s13, [#allocation3]  }
  0x13   :  { %s260_s28 = scalar_lea.hbm %s384_s1, 1024 }
  0x14   :  { %p261_p8 = scmp.ne.s32.totalorder %s384_s1, %s260_s28  ;;  %p264_p9 = scmp.lt.u32.totalorder %s260_s28, %s384_s1 }
  0x16   :  { %p266_p10 = pnand %p264_p9, %p261_p8 }
  0x18   :  { %269 = shalt.err (!%p266_p10)
}
  0x19   :  { %s270_s6 = scalar_lea.vmem %s337_s15, 1024  ;;  %p275_p12 = scmp.lt.s32.totalorder %s337_s15, %s337_s15 }
  0x1a   :  { %p271_p11 = scmp.ne.s32.totalorder %s337_s15, %s270_s6  ;;  %p276_p13 = scmp.lt.s32.totalorder %s270_s6, %s270_s6 }
  0x1c   :  { %p277_p0 = por %p276_p13, %p275_p12 }
  0x1e   :  { %p278_p1 = pnand %p277_p0, %p271_p11 }
  0x20   :  { %281 = shalt.err (!%p278_p1)
}
  0x21   :  { %s312_s0 = smov 64   ;;  %s313_s7 = smov 4  }
  0x22   :  { %32 = dma.hbm_to_vmem [thread:$0]  %s384_s1, 1024, %s337_s15, [#allocation6], %s312_s0, %s312_s0, %s313_s7  }
  0x23   :  { %304 = dma.done.wait [#allocation3], 128  }
  0x24   :  { %305 = vsyncadd [#allocation3], 4294967168 }
  0x25   :  { %306 = dma.done.wait [#allocation6], 1024  }
  0x26   :  { %307 = vsyncadd [#allocation6], 4294966272  ;;  %v314_v0 = vmov 0.0   ;;  %vm315_vm0 = vmmov 0   ;;  %v230_v1 = vld [vmem:[#allocation5] sm:$0xff]   ;;  %v231_v2 = vld [vmem:[#allocation5 + $0x8] sm:$0xff]  }
  0x27   :  { %203 = vmatprep.subr.bf16.mxu0 %v314_v0  ;;  %219 = vmatprep.mubr.msk.bf16.mxu0 %vm315_vm0, %v314_v0  ;;  %v232_v3 = vld [vmem:[#allocation5 + $0x10] sm:$0xff]   ;;  %v233_v4 = vld [vmem:[#allocation5 + $0x18] sm:$0xff]   ;;  %v234_v5 = vld [vmem:[#allocation5 + $0x20] sm:$0xff]   ;;  %s316_s11 = smov [#allocation7]  }
  0x28   :  { %204 = vmatpush3.bf16.msra.mxu0 %v230_v1  ;;  %v235_v6 = vld [vmem:[#allocation5 + $0x28] sm:$0xff]   ;;  %v236_v7 = vld [vmem:[#allocation5 + $0x30] sm:$0xff]   ;;  %v237_v8 = vld [vmem:[#allocation5 + $0x38] sm:$0xff]   ;;  %s175_s12 = sshll.u32 %s316_s11, 4  ;;  %s176_s12 = int_to_ptr.vmem [resolvable:$true] %s175_s12 }
  0x29   :  { %205 = vmatprep.subr.bf16.mxu0 %v314_v0  ;;  %v48_v9 = vld [vmem:[#allocation2] sm:$0xff]  ;;  %s282_s13 = scalar_lea.vmem %s176_s12, 128  ;;  %p287_p3 = scmp.lt.s32.totalorder %s176_s12, %s176_s12 }
  0x2a   :  { %v49_v10 = vpack.c.bf16 %v48_v9, %v48_v9  ;;  %v193_v12 = vld [vmem:[%s385_s2] ss:$0 sm:$0xff]  ;;  %p283_p2 = scmp.ne.s32.totalorder %s176_s12, %s282_s13  ;;  %p288_p4 = scmp.lt.s32.totalorder %s282_s13, %s282_s13 }
  0x2c   :  { %206 = vmatpush3.bf16.msra.mxu0 %v231_v2  ;;  %p289_p5 = por %p288_p4, %p287_p3 }
  0x2d   :  { %207 = vmatprep.subr.bf16.mxu0 %v314_v0 }
  0x2e   :  { %p290_p6 = pnand %p289_p5, %p283_p2 }
  0x30   :  { %208 = vmatpush3.bf16.msra.mxu0 %v232_v3 }
  0x31   :  { %209 = vmatprep.subr.bf16.mxu0 %v314_v0 }
  0x34   :  { %210 = vmatpush3.bf16.msra.mxu0 %v233_v4 }
  0x35   :  { %211 = vmatprep.subr.bf16.mxu0 %v314_v0 }
  0x38   :  { %212 = vmatpush3.bf16.msra.mxu0 %v234_v5 }
  0x39   :  { %213 = vmatprep.subr.bf16.mxu0 %v314_v0 }
  0x3c   :  { %214 = vmatpush3.bf16.msra.mxu0 %v235_v6 }
  0x3d   :  { %215 = vmatprep.subr.bf16.mxu0 %v314_v0 }
  0x40   :  { %216 = vmatpush3.bf16.msra.mxu0 %v236_v7 }
  0x41   :  { %217 = vmatprep.subr.bf16.mxu0 %v314_v0 }
  0x44   :  { %218 = vmatpush3.bf16.msra.mxu0 %v237_v8 }
  0x47   :  { %220 = vmatmul.mubr.bf16.vlgmr.msra.gmra.mrb[0].mxu0 %v49_v10 }
 0x11a   :  { %v148_v11 = vpop.f32.mrb[0].mxu0 }
 0x11b   :  { %v221_v13 = vpop.f32.mrb[1].mxu0  ;;  %v167_v16 = vadd.f32 %v193_v12, %v148_v11 }
 0x11c   :  { %v151_v14 = vpop.f32.mrb[2].mxu0 }
 0x11d   :  { %v222_v15 = vpop.f32.mrb[3].mxu0  ;;  %168 = vst [vmem:[#allocation7] sm:$0xff] %v167_v16 }
 0x11e   :  { %293 = shalt.err (!%p290_p6)
}
 0x11f   :  { %s294_s16 = scalar_lea.hbm %s386_s3, 128 }
 0x120   :  { %p295_p7 = scmp.ne.s32.totalorder %s386_s3, %s294_s16  ;;  %p298_p8 = scmp.lt.u32.totalorder %s294_s16, %s386_s3 }
 0x122   :  { %p300_p9 = pnand %p298_p8, %p295_p7 }
 0x124   :  { %303 = shalt.err (!%p300_p9)
}
 0x125   :  { %178 = dma.vmem_to_hbm [thread:$0]  %s176_s12, 128, %s386_s3, [#allocation4]  }
 0x126   :  { %308 = dma.done.wait [#allocation4], 128  }
 0x127   :  { %309 = vsyncadd [#allocation4], 4294967168 }
 0x128   :  { %182 = vsyncpa [#allocation3], 1 }
 0x129   :  { %183 = vsyncpa [#allocation6], 1 }
 0x12a   :  { %184 = vsyncpa [#allocation4], 1 }

</bundles_post_ra>
